<compile_context>
chip_gen: v5e
topology: v5e:2x2
jax: 0.10.0
libtpu: 0.0.40
codegen_flags: <defaults>
</compile_context>

<pallas_src>
import functools

import jax
import jax.numpy as jnp
from jax import lax
from jax.experimental import pallas as pl
from jax.experimental.pallas import tpu as pltpu


_MODES = ("mse", "bcelogits", "bce", "vanilla", "wgan")


def _per_element_loss(x, mode):
    """Element-wise loss against real target == 1 (f32 in, f32 out)."""
    if mode == "mse":
        d = x - 1.0
        return d * d
    if mode in ("bcelogits", "bce"):
        # BCEWithLogits, target 1: softplus(-x) = max(x,0) - x + log1p(exp(-|x|))
        return jnp.maximum(x, 0.0) - x + jnp.log1p(jnp.exp(-jnp.abs(x)))
    if mode == "vanilla":
        # log(sigmoid(x)) = -softplus(-x)  (the overall minus sign is applied
        # in the wrapper, matching -landa * mean(log(sigmoid(x))))
        return -(jnp.maximum(-x, 0.0) + jnp.log1p(jnp.exp(-jnp.abs(x))))
    if mode == "wgan":
        return x
    raise ValueError(f"unknown adversarial_loss mode: {mode}")


def _make_kernel(mode, *, tile_rows, lane, sub, inner, n_valid, needs_mask):
    """Kernel that accumulates sum(per_element_loss) into a resident (sub, lane) block."""

    def kernel(x_ref, acc_ref):
        i = pl.program_id(1)  # inner (reduction) step

        @pl.when(i == 0)
        def _init():
            acc_ref[...] = jnp.zeros_like(acc_ref)

        x = x_ref[...].astype(jnp.float32)
        per = _per_element_loss(x, mode)

        if needs_mask:
            # Mask elements beyond the true element count (ragged last tile,
            # padded tail, or duplicated/clamped tail blocks).  jnp.where is a
            # select, so garbage/NaN in the invalid region cannot leak.
            o = pl.program_id(0)
            row = lax.broadcasted_iota(jnp.int32, (tile_rows, lane), 0)
            col = lax.broadcasted_iota(jnp.int32, (tile_rows, lane), 1)
            start_row = (o * inner + i) * tile_rows
            flat_idx = (start_row + row) * lane + col
            per = jnp.where(flat_idx < n_valid, per, 0.0)

        if tile_rows > sub:
            # Leading-axis sum over (sub, lane) vreg slabs: pure VPU adds,
            # no cross-lane/XLU work inside the hot loop.
            partial = per.reshape(tile_rows // sub, sub, lane).sum(axis=0)
        else:
            partial = per
        acc_ref[...] += partial

    return kernel


@functools.partial(jax.jit, static_argnames=("mode", "landa", "max_block_bytes"))
def generator_loss(x_fake, *, mode: str = "bcelogits", landa: float = 1e-3,
                   max_block_bytes: int = 2 * 1024 * 1024):
    """Pallas implementation of Generator_loss.forward(x_fake)."""
    if mode not in _MODES:
        raise ValueError(f"unknown adversarial_loss mode: {mode}")

    n = 1
    for d in x_fake.shape:
        n *= d
    flat = x_fake.reshape(-1)

    # Lane-dense view: pick the widest lane count that makes the reshape a
    # free (copy-less) row-major view.
    lane = None
    for cand in (1024, 512, 256, 128):
        if n % cand == 0:
            lane = cand
            break
    if lane is None:
        # Awkward element counts only: pad the flat vector up to a multiple of
        # 128 (the only path that copies the input); padded tail is masked.
        lane = 128
        pad = (-n) % lane
        flat = jnp.pad(flat, (0, pad))
    padded_n = flat.shape[0]
    rows = padded_n // lane
    x2 = flat.reshape(rows, lane)

    # Tile sizing: big blocks (default ~2 MiB) aligned to the dtype's sublane
    # packing granularity (8 for f32, 16 for bf16, ...).
    itemsize = jnp.dtype(x_fake.dtype).itemsize
    sub_gran = max(8, 32 // itemsize)
    target_rows = max(sub_gran,
                      (max_block_bytes // (lane * itemsize)) // sub_gran * sub_gran)
    if rows <= sub_gran:
        tile_rows = rows                      # full-dim block (always legal)
    else:
        tile_rows = min(target_rows, (rows // sub_gran) * sub_gran)
    # Accumulator sublane height (f32 accumulator).
    sub = 8 if tile_rows % 8 == 0 else tile_rows

    num_row_tiles = -(-rows // tile_rows)
    # v7x: 2 TensorCores -> one partial-output slab per core; harmless on 1-TC chips.
    n_outer = 2 if num_row_tiles >= 2 else 1
    inner = -(-num_row_tiles // n_outer)
    # Mask needed whenever the grid covers more elements than actually exist.
    needs_mask = (n_outer * inner * tile_rows * lane) > n

    last_block = num_row_tiles - 1

    def x_index_map(o, i):
        # Clamp duplicated tail blocks into range; their contribution is
        # zeroed by the in-kernel mask (intended start >= n).
        return (jnp.minimum(o * inner + i, last_block), 0)

    kernel = _make_kernel(mode, tile_rows=tile_rows, lane=lane, sub=sub,
                          inner=inner, n_valid=n, needs_mask=needs_mask)

    partials = pl.pallas_call(
        kernel,
        out_shape=jax.ShapeDtypeStruct((n_outer, sub, lane), jnp.float32),
        grid_spec=pltpu.PrefetchScalarGridSpec(
            num_scalar_prefetch=0,
            grid=(n_outer, inner),
            in_specs=[pl.BlockSpec((tile_rows, lane), x_index_map)],
            out_specs=pl.BlockSpec((None, sub, lane), lambda o, i: (o, 0, 0)),
        ),
        compiler_params=pltpu.CompilerParams(
            dimension_semantics=("parallel", "arbitrary")),
    )(x2)

    # Tiny final reduction + scalar glue (mean + +/- landa^2) in the wrapper.
    total = jnp.sum(partials)
    mean = total / jnp.float32(n)
    sign = 1.0 if mode in ("mse", "bcelogits", "bce") else -1.0
    return sign * (landa * landa) * mean


def _reference(x_fake, mode, landa):
    """Pure-JAX reference mirroring the PyTorch module."""
    x = x_fake.astype(jnp.float32)
    if mode == "mse":
        return landa * (landa * jnp.mean((x - 1.0) ** 2))
    if mode in ("bcelogits", "bce"):
        return landa * (landa * jnp.mean(jnp.maximum(x, 0.0) - x
                                         + jnp.log1p(jnp.exp(-jnp.abs(x)))))
    if mode == "vanilla":
        return landa * (-landa * jnp.mean(jax.nn.log_sigmoid(x)))
    if mode == "wgan":
        return landa * (-landa * jnp.mean(x))
    raise ValueError(mode)


if __name__ == "__main__":
    key = jax.random.PRNGKey(0)

    # (shape, dtype, max_block_bytes) — small shapes exercising every code path:
    test_cases = [
        ((2, 8, 32), jnp.float32, 2 * 1024 * 1024),    # module's natural shape
        ((4, 36, 32), jnp.float32, 2 * 1024 * 1024),   # ragged rows -> masked tail tile
        ((3, 7, 11), jnp.float32, 2 * 1024 * 1024),    # N % 128 != 0 -> pad fallback + mask
        ((4, 96, 64), jnp.float32, 4096),              # multi-tile, dual-core, clamped tail
        ((4, 96, 64), jnp.bfloat16, 2 * 1024 * 1024),  # bf16 input (halved HBM bytes)
    ]

    ok = True
    for shape, dtype, mbb in test_cases:
        key, sub_key = jax.random.split(key)
        x_fake = jax.random.normal(sub_key, shape, dtype=jnp.float32).astype(dtype)
        for mode in _MODES:
            out = generator_loss(x_fake, mode=mode, landa=1e-3,
                                 max_block_bytes=mbb)
            out = jax.block_until_ready(out)
            ref = _reference(x_fake, mode, 1e-3)
            if not jnp.allclose(out, ref, rtol=1e-4, atol=1e-12):
                ok = False
                print(f"MISMATCH shape={shape} dtype={jnp.dtype(dtype).name} "
                      f"mode={mode}: kernel={out} ref={ref}")

    if ok:
        print("KERNEL_OK")
</pallas_src>

<mosaic_0001>
module attributes {stable_mosaic.version = 11 : i64} {
  func.func @kernel(%arg0: i32, %arg1: i32, %arg2: memref<1x512xf32, #tpu.memory_space<vmem>>, %arg3: memref<1x1x512xf32, #tpu.memory_space<vmem>>) attributes {dimension_semantics = [#tpu.dimension_semantics<parallel>, #tpu.dimension_semantics<arbitrary>], iteration_bounds = array<i64: 1, 1>, scalar_prefetch = 0 : i64, scratch_operands = 0 : i64, tpu.core_type = #tpu.core_type<tc>, window_params = [{transform_indices = @transform_0, window_bounds = array<i64: 1, 512>}, {transform_indices = @transform_1, window_bounds = array<i64: 1, 1, 512>}]} {
    %c0_i32 = arith.constant 0 : i32
    %0 = arith.cmpi eq, %arg1, %c0_i32 : i32
    %1 = arith.extui %0 : i1 to i32
    %c0_i32_0 = arith.constant 0 : i32
    %2 = arith.cmpi ne, %1, %c0_i32_0 : i32
    scf.if %2 {
      %cst_8 = arith.constant 0.000000e+00 : f32
      %13 = vector.broadcast %cst_8 : f32 to vector<1x512xf32>
      %c0_9 = arith.constant 0 : index
      %c0_10 = arith.constant 0 : index
      %c0_11 = arith.constant 0 : index
      %14 = vector.load %arg3[%c0_9, %c0_10, %c0_11] : memref<1x1x512xf32, #tpu.memory_space<vmem>>, vector<1x1x512xf32>
      %15 = vector.shape_cast %14 : vector<1x1x512xf32> to vector<1x512xf32>
      %16 = vector.shape_cast %13 : vector<1x512xf32> to vector<1x1x512xf32>
      tpu.vector_store %arg3[%c0_9, %c0_10, %c0_11], %16 {strides = array<i32>} : memref<1x1x512xf32, #tpu.memory_space<vmem>>, vector<1x1x512xf32>,
    } else {
    }
    %c0 = arith.constant 0 : index
    %c0_1 = arith.constant 0 : index
    %3 = vector.load %arg2[%c0, %c0_1] : memref<1x512xf32, #tpu.memory_space<vmem>>, vector<1x512xf32>
    %cst = arith.constant 1.000000e+00 : f32
    %4 = vector.broadcast %cst : f32 to vector<1x512xf32>
    %5 = arith.subf %3, %4 : vector<1x512xf32>
    %6 = arith.mulf %5, %5 : vector<1x512xf32>
    %c0_2 = arith.constant 0 : index
    %c0_3 = arith.constant 0 : index
    %c0_4 = arith.constant 0 : index
    %7 = vector.load %arg3[%c0_2, %c0_3, %c0_4] : memref<1x1x512xf32, #tpu.memory_space<vmem>>, vector<1x1x512xf32>
    %8 = vector.shape_cast %7 : vector<1x1x512xf32> to vector<1x512xf32>
    %9 = arith.addf %8, %6 : vector<1x512xf32>
    %c0_5 = arith.constant 0 : index
    %c0_6 = arith.constant 0 : index
    %c0_7 = arith.constant 0 : index
    %10 = vector.load %arg3[%c0_5, %c0_6, %c0_7] : memref<1x1x512xf32, #tpu.memory_space<vmem>>, vector<1x1x512xf32>
    %11 = vector.shape_cast %10 : vector<1x1x512xf32> to vector<1x512xf32>
    %12 = vector.shape_cast %9 : vector<1x512xf32> to vector<1x1x512xf32>
    tpu.vector_store %arg3[%c0_5, %c0_6, %c0_7], %12 {strides = array<i32>} : memref<1x1x512xf32, #tpu.memory_space<vmem>>, vector<1x1x512xf32>,
    return
  }
  func.func @transform_0(%arg0: i32, %arg1: i32) -> (i32, i32) {
    %c1_i32 = arith.constant 1 : i32
    %0 = arith.muli %arg0, %c1_i32 : i32
    %1 = arith.addi %0, %arg1 : i32
    %c0_i32 = arith.constant 0 : i32
    %2 = arith.minsi %1, %c0_i32 : i32
    %c0_i32_0 = arith.constant 0 : i32
    %c0_i32_1 = arith.constant 0 : i32
    return %2, %c0_i32_0 : i32, i32
  }
  func.func @transform_1(%arg0: i32, %arg1: i32) -> (i32, i32, i32) {
    %c0_i32 = arith.constant 0 : i32
    %c0_i32_0 = arith.constant 0 : i32
    %c0_i32_1 = arith.constant 0 : i32
    return %arg0, %c0_i32, %c0_i32_0 : i32, i32, i32
  }
}

</mosaic_0001>

<bundles_post_ra>
// kernel: generator_loss.1
= control target key start
LH: loop header
LB: loop body
LE: loop exit
PB: predicated region body
PF: predicated region fallthrough
CT: control target
= control target key end

     0   :  { %v39_v0 = vlaneseq  ;;  %v66_v2 = vmov 0.0   ;;  %s89_s0 = inlined_call_operand.vmem [shape: f32[1,512], index: 0, kind: input, shape index: {}]   ;;  %s90_s1 = inlined_call_operand.vmem [shape: f32[1,1,512], index: 1, kind: output, shape index: {}]  }
   0x1   :  { %v44_v1 = vld [vmem:[%s89_s0] sm:$0xf] }
   0x2   :  { %vm41_vm0 = vcmp.lt.s32.totalorder %v39_v0, 512  ;;  %v64_v3 = vadd.f32 -1.0, %v44_v1 }
   0x3   :  { %43 = vst.msk [vmem:[%s90_s1] sm:$0xf] %vm41_vm0, %v66_v2 }
   0x4   :  { %v46_v4 = vmul.f32 %v64_v3, %v64_v3 }
   0xa   :  { %v47_v5 = vld [vmem:[%s90_s1] sm:$0xf] }
   0xb   :  { %v48_v6 = vadd.f32 %v47_v5, %v46_v4 }
   0xd   :  { %53 = vst.msk [vmem:[%s90_s1] sm:$0xf] %vm41_vm0, %v48_v6 }

</bundles_post_ra>
